<compile_context>
chip_gen: v7x
topology: tpu7x:2x2x1
jax: 0.10.0
libtpu: 0.0.40
codegen_flags: <defaults>
</compile_context>

<pallas_src>
import math

import jax
import jax.numpy as jnp
from jax.experimental import pallas as pl
from jax.experimental.pallas import tpu as pltpu

HIDDEN = 32
NUM_HEADS = 8
HEAD_DIM = HIDDEN // NUM_HEADS
LN_EPS = 1e-5


def mha_ln_kernel(x_ref, w_ref, params_ref, masks_ref, o_ref):
    S, H = x_ref.shape                  # (seq, hidden) -- one batch element per grid step
    NH = NUM_HEADS
    HD = H // NH

    x = x_ref[...]                      # (S, H) -- also the residual

    w = w_ref[...]                      # (H, 4H) = [Wq*scale | Wk | Wv | Wo]
    wqkv = w[:, 0:3 * H]
    wo = w[:, 3 * H:4 * H]

    bqkv = params_ref[0:1, :]           # (1, 3H), q part pre-scaled
    bo = params_ref[1:2, 0:H]
    gamma = params_ref[1:2, H:2 * H]
    beta = params_ref[1:2, 2 * H:3 * H]

    masks = masks_ref[...]              # (NH*S, H + S), precomputed constants
    head_mask = masks[:, 0:H]           # (NH*S, H): 1 iff column d belongs to head (row // S)
    repl = masks[:, H:H + S]            # (NH*S, S): one-hot row replication, 1 iff col == row % S

    # --- fused QKV projection: one MXU push; 1/sqrt(HD) folded into q weight/bias ---
    qkv = jnp.dot(x, wqkv, preferred_element_type=jnp.float32) + bqkv
    q = qkv[:, 0:H]
    k = qkv[:, H:2 * H]
    v = qkv[:, 2 * H:3 * H]

    # --- head expansion via MXU replication + one elementwise mask (block-diagonal layout) ---
    k_exp = jnp.dot(repl, k, preferred_element_type=jnp.float32) * head_mask    # (NH*S, H)
    v_exp = jnp.dot(repl, v, preferred_element_type=jnp.float32) * head_mask    # (NH*S, H)

    # All-head scores in a single MXU push: scores[i, h*S + j] = head-h score(query i, key j).
    scores = jax.lax.dot_general(q, k_exp, (((1,), (1,)), ((), ())),
                                 preferred_element_type=jnp.float32)            # (S, NH*S)

    # Softmax per head segment of S columns.  The row-global max is a valid stabilizer since
    # it is constant within every segment.  NOTE: if some head's scores sit >~88 below the row
    # max, that segment underflows to denom=0; fine for the inputs/scales used here.
    row_max = jnp.max(scores, axis=-1, keepdims=True)
    exp_s = jnp.exp(scores - row_max)                                           # (S, NH*S)

    # Per-head denominators directly in output layout, and the unnormalized context.
    denom = jnp.dot(exp_s, head_mask, preferred_element_type=jnp.float32)       # (S, H)
    ctx_un = jnp.dot(exp_s, v_exp, preferred_element_type=jnp.float32)          # (S, H)

    # approx reciprocal (EUP slot) + one Newton-Raphson refinement (~2^-24 rel err).
    r = pl.reciprocal(denom, approx=True)
    r = r * (2.0 - denom * r)
    ctx = ctx_un * r

    # --- output projection (+ dropout p=0.1 -> identity in eval mode) ---
    attn_out = jnp.dot(ctx, wo, preferred_element_type=jnp.float32) + bo

    # --- residual + LayerNorm over last dim ---
    y = x + attn_out
    mean = jnp.mean(y, axis=-1, keepdims=True)
    yc = y - mean
    var = jnp.mean(yc * yc, axis=-1, keepdims=True)
    o_ref[...] = yc * jax.lax.rsqrt(var + LN_EPS) * gamma + beta


def self_attention_block(x, w_all, params, masks):
    B, S, H = x.shape
    return pl.pallas_call(
        mha_ln_kernel,
        out_shape=jax.ShapeDtypeStruct((B, S, H), jnp.float32),
        grid=(B,),
        in_specs=[
            pl.BlockSpec((None, S, H), lambda b: (b, 0, 0)),        # x: one batch element per step
            pl.BlockSpec(w_all.shape, lambda b: (0, 0)),            # fused (H, 4H) weights
            pl.BlockSpec(params.shape, lambda b: (0, 0)),           # (2, 3H) biases / ln params
            pl.BlockSpec(masks.shape, lambda b: (0, 0)),            # (NH*S, H+S) constant masks
        ],
        out_specs=pl.BlockSpec((None, S, H), lambda b: (b, 0, 0)),
        compiler_params=pltpu.CompilerParams(dimension_semantics=("parallel",)),
    )(x, w_all, params, masks)


def prepare_kernel_params(in_proj_w, in_proj_b, out_proj_w, out_proj_b, gamma, beta, seq):
    """Fuse / pre-transpose / pre-scale PyTorch-layout parameters and build constant masks."""
    H = out_proj_w.shape[0]
    NH = NUM_HEADS
    HD = H // NH
    scale = 1.0 / math.sqrt(HD)

    wq_t = in_proj_w[0 * H:1 * H].T * scale
    wk_t = in_proj_w[1 * H:2 * H].T
    wv_t = in_proj_w[2 * H:3 * H].T
    wo_t = out_proj_w.T
    w_all = jnp.concatenate([wq_t, wk_t, wv_t, wo_t], axis=1)                   # (H, 4H)

    bqkv = jnp.concatenate([in_proj_b[0 * H:1 * H] * scale,
                            in_proj_b[1 * H:2 * H],
                            in_proj_b[2 * H:3 * H]])                            # (3H,)
    row1 = jnp.concatenate([out_proj_b, gamma, beta])                           # (3H,)
    params = jnp.stack([bqkv, row1], axis=0)                                    # (2, 3H)

    # head_mask[c, d] = 1 iff hidden column d belongs to head (c // seq)
    c = jnp.arange(NH * seq)
    d = jnp.arange(H)
    head_mask = ((d[None, :] // HD) == (c[:, None] // seq)).astype(jnp.float32)  # (NH*S, H)
    # repl[c, j] = 1 iff j == c % seq  (expanded row c copies k/v row c % seq)
    j = jnp.arange(seq)
    repl = (j[None, :] == (c[:, None] % seq)).astype(jnp.float32)                # (NH*S, S)
    masks = jnp.concatenate([head_mask, repl], axis=1)                           # (NH*S, H+S)

    return w_all, params, masks


def reference(x, in_proj_w, in_proj_b, out_proj_w, out_proj_b, gamma, beta):
    """Pure-JAX reference mirroring PyTorch nn.MultiheadAttention (eval) + LayerNorm."""
    B, S, H = x.shape
    wq_t = in_proj_w[0 * H:1 * H].T
    wk_t = in_proj_w[1 * H:2 * H].T
    wv_t = in_proj_w[2 * H:3 * H].T
    q = x @ wq_t + in_proj_b[0 * H:1 * H]
    k = x @ wk_t + in_proj_b[1 * H:2 * H]
    v = x @ wv_t + in_proj_b[2 * H:3 * H]
    qh = q.reshape(B, S, NUM_HEADS, HEAD_DIM).transpose(0, 2, 1, 3)
    kh = k.reshape(B, S, NUM_HEADS, HEAD_DIM).transpose(0, 2, 1, 3)
    vh = v.reshape(B, S, NUM_HEADS, HEAD_DIM).transpose(0, 2, 1, 3)
    scores = jnp.einsum("bhqd,bhkd->bhqk", qh, kh) / math.sqrt(HEAD_DIM)
    p = jax.nn.softmax(scores, axis=-1)
    ctx = jnp.einsum("bhqk,bhkd->bhqd", p, vh).transpose(0, 2, 1, 3).reshape(B, S, H)
    attn_out = ctx @ out_proj_w.T + out_proj_b
    y = x + attn_out
    mean = jnp.mean(y, axis=-1, keepdims=True)
    var = jnp.mean((y - mean) ** 2, axis=-1, keepdims=True)
    return (y - mean) * jax.lax.rsqrt(var + LN_EPS) * gamma + beta


if __name__ == "__main__":
    B, S, H = 2, 8, HIDDEN
    key = jax.random.PRNGKey(0)
    kx, kin, kout, kbin, kbout = jax.random.split(key, 5)

    x = jax.random.normal(kx, (B, S, H), dtype=jnp.float32)

    # Deterministic parameter init (shapes match nn.MultiheadAttention / nn.LayerNorm):
    #   in_proj_weight: (3H, H), in_proj_bias: (3H,)
    #   out_proj.weight: (H, H), out_proj.bias: (H,)
    #   LayerNorm weight/bias: (H,)
    bound_in = 1.0 / math.sqrt(H)
    in_proj_w = jax.random.uniform(kin, (3 * H, H), jnp.float32, -bound_in, bound_in)
    in_proj_b = jax.random.uniform(kbin, (3 * H,), jnp.float32, -bound_in, bound_in)
    out_proj_w = jax.random.uniform(kout, (H, H), jnp.float32, -bound_in, bound_in)
    out_proj_b = jax.random.uniform(kbout, (H,), jnp.float32, -bound_in, bound_in)
    gamma = jnp.ones((H,), jnp.float32)
    beta = jnp.zeros((H,), jnp.float32)

    w_all, params, masks = prepare_kernel_params(
        in_proj_w, in_proj_b, out_proj_w, out_proj_b, gamma, beta, S)

    out = self_attention_block(x, w_all, params, masks)
    out = jax.block_until_ready(out)

    ref = reference(x, in_proj_w, in_proj_b, out_proj_w, out_proj_b, gamma, beta)
    assert out.shape == (B, S, H)
    assert jnp.allclose(out, ref, atol=1e-4, rtol=1e-4), (
        f"max abs err {float(jnp.max(jnp.abs(out - ref)))}")

    print("KERNEL_OK")
</pallas_src>

<mosaic_0001>
module attributes {stable_mosaic.version = 11 : i64} {
  func.func @mha_ln_kernel(%arg0: i32, %arg1: memref<1x8x32xf32, #tpu.memory_space<vmem>>, %arg2: memref<32x128xf32, #tpu.memory_space<vmem>>, %arg3: memref<2x96xf32, #tpu.memory_space<vmem>>, %arg4: memref<64x40xf32, #tpu.memory_space<vmem>>, %arg5: memref<1x8x32xf32, #tpu.memory_space<vmem>>) attributes {dimension_semantics = [#tpu.dimension_semantics<parallel>], iteration_bounds = array<i64: 2>, scalar_prefetch = 0 : i64, scratch_operands = 0 : i64, tpu.core_type = #tpu.core_type<tc>, window_params = [{transform_indices = @transform_0, window_bounds = array<i64: 1, 8, 32>}, {pipeline_mode = #tpu.pipeline_mode<synchronous>, transform_indices = @transform_1, window_bounds = array<i64: 32, 128>}, {pipeline_mode = #tpu.pipeline_mode<synchronous>, transform_indices = @transform_2, window_bounds = array<i64: 2, 96>}, {pipeline_mode = #tpu.pipeline_mode<synchronous>, transform_indices = @transform_3, window_bounds = array<i64: 64, 40>}, {transform_indices = @transform_4, window_bounds = array<i64: 1, 8, 32>}]} {
    %c0 = arith.constant 0 : index
    %c0_0 = arith.constant 0 : index
    %c0_1 = arith.constant 0 : index
    %0 = vector.load %arg1[%c0, %c0_0, %c0_1] : memref<1x8x32xf32, #tpu.memory_space<vmem>>, vector<1x8x32xf32>
    %1 = vector.shape_cast %0 : vector<1x8x32xf32> to vector<8x32xf32>
    %c0_2 = arith.constant 0 : index
    %c0_3 = arith.constant 0 : index
    %2 = vector.load %arg2[%c0_2, %c0_3] : memref<32x128xf32, #tpu.memory_space<vmem>>, vector<32x128xf32>
    %3 = vector.extract_strided_slice %2 {offsets = [0, 0], sizes = [32, 96], strides = [1, 1]} : vector<32x128xf32> to vector<32x96xf32>
    %4 = vector.extract_strided_slice %2 {offsets = [0, 96], sizes = [32, 32], strides = [1, 1]} : vector<32x128xf32> to vector<32x32xf32>
    %c0_4 = arith.constant 0 : index
    %c0_5 = arith.constant 0 : index
    %5 = vector.load %arg3[%c0_4, %c0_5] : memref<2x96xf32, #tpu.memory_space<vmem>>, vector<1x96xf32>
    %c1 = arith.constant 1 : index
    %c0_6 = arith.constant 0 : index
    %6 = vector.load %arg3[%c1, %c0_6] : memref<2x96xf32, #tpu.memory_space<vmem>>, vector<1x32xf32>
    %c1_7 = arith.constant 1 : index
    %c32 = arith.constant 32 : index
    %7 = vector.load %arg3[%c1_7, %c32] : memref<2x96xf32, #tpu.memory_space<vmem>>, vector<1x32xf32>
    %c1_8 = arith.constant 1 : index
    %c64 = arith.constant 64 : index
    %8 = vector.load %arg3[%c1_8, %c64] : memref<2x96xf32, #tpu.memory_space<vmem>>, vector<1x32xf32>
    %c0_9 = arith.constant 0 : index
    %c0_10 = arith.constant 0 : index
    %9 = vector.load %arg4[%c0_9, %c0_10] : memref<64x40xf32, #tpu.memory_space<vmem>>, vector<64x40xf32>
    %10 = vector.extract_strided_slice %9 {offsets = [0, 0], sizes = [64, 32], strides = [1, 1]} : vector<64x40xf32> to vector<64x32xf32>
    %11 = vector.extract_strided_slice %9 {offsets = [0, 32], sizes = [64, 8], strides = [1, 1]} : vector<64x40xf32> to vector<64x8xf32>
    %cst = arith.constant dense<0.000000e+00> : vector<8x96xf32>
    %12 = tpu.matmul %1, %3, %cst {dimension_numbers = #tpu.dot_dimension_numbers<[1], [0], [0], [1], [0, 0, 1, 1], [], []>} : vector<8x32xf32>, vector<32x96xf32>, vector<8x96xf32> -> vector<8x96xf32>
    %13 = vector.broadcast %5 : vector<1x96xf32> to vector<8x96xf32>
    %14 = arith.addf %12, %13 : vector<8x96xf32>
    %15 = vector.extract_strided_slice %14 {offsets = [0, 0], sizes = [8, 32], strides = [1, 1]} : vector<8x96xf32> to vector<8x32xf32>
    %16 = vector.extract_strided_slice %14 {offsets = [0, 32], sizes = [8, 32], strides = [1, 1]} : vector<8x96xf32> to vector<8x32xf32>
    %17 = vector.extract_strided_slice %14 {offsets = [0, 64], sizes = [8, 32], strides = [1, 1]} : vector<8x96xf32> to vector<8x32xf32>
    %cst_11 = arith.constant dense<0.000000e+00> : vector<64x32xf32>
    %18 = tpu.matmul %11, %16, %cst_11 {dimension_numbers = #tpu.dot_dimension_numbers<[1], [0], [0], [1], [0, 0, 1, 1], [], []>} : vector<64x8xf32>, vector<8x32xf32>, vector<64x32xf32> -> vector<64x32xf32>
    %19 = arith.mulf %18, %10 : vector<64x32xf32>
    %cst_12 = arith.constant dense<0.000000e+00> : vector<64x32xf32>
    %20 = tpu.matmul %11, %17, %cst_12 {dimension_numbers = #tpu.dot_dimension_numbers<[1], [0], [0], [1], [0, 0, 1, 1], [], []>} : vector<64x8xf32>, vector<8x32xf32>, vector<64x32xf32> -> vector<64x32xf32>
    %21 = arith.mulf %20, %10 : vector<64x32xf32>
    %cst_13 = arith.constant dense<0.000000e+00> : vector<8x64xf32>
    %22 = tpu.matmul %15, %19, %cst_13 {dimension_numbers = #tpu.dot_dimension_numbers<[1], [1], [0], [0], [0, 0, 1, 0], [], []>} : vector<8x32xf32>, vector<64x32xf32>, vector<8x64xf32> -> vector<8x64xf32>
    %cst_14 = arith.constant dense<0xFF800000> : vector<8xf32>
    %23 = vector.multi_reduction <maximumf>, %22, %cst_14 [1] : vector<8x64xf32> to vector<8xf32>
    %24 = vector.shape_cast %23 : vector<8xf32> to vector<8x1xf32>
    %25 = vector.broadcast %24 : vector<8x1xf32> to vector<8x64xf32>
    %26 = arith.subf %22, %25 : vector<8x64xf32>
    %27 = math.exp %26 : vector<8x64xf32>
    %cst_15 = arith.constant dense<0.000000e+00> : vector<8x32xf32>
    %28 = tpu.matmul %27, %10, %cst_15 {dimension_numbers = #tpu.dot_dimension_numbers<[1], [0], [0], [1], [0, 0, 1, 1], [], []>} : vector<8x64xf32>, vector<64x32xf32>, vector<8x32xf32> -> vector<8x32xf32>
    %cst_16 = arith.constant dense<0.000000e+00> : vector<8x32xf32>
    %29 = tpu.matmul %27, %21, %cst_16 {dimension_numbers = #tpu.dot_dimension_numbers<[1], [0], [0], [1], [0, 0, 1, 1], [], []>} : vector<8x64xf32>, vector<64x32xf32>, vector<8x32xf32> -> vector<8x32xf32>
    %30 = tpu.reciprocal %28 {approx = true} : vector<8x32xf32> -> vector<8x32xf32>
    %31 = arith.mulf %28, %30 : vector<8x32xf32>
    %cst_17 = arith.constant 2.000000e+00 : f32
    %32 = vector.broadcast %cst_17 : f32 to vector<8x32xf32>
    %33 = arith.subf %32, %31 : vector<8x32xf32>
    %34 = arith.mulf %30, %33 : vector<8x32xf32>
    %35 = arith.mulf %29, %34 : vector<8x32xf32>
    %cst_18 = arith.constant dense<0.000000e+00> : vector<8x32xf32>
    %36 = tpu.matmul %35, %4, %cst_18 {dimension_numbers = #tpu.dot_dimension_numbers<[1], [0], [0], [1], [0, 0, 1, 1], [], []>} : vector<8x32xf32>, vector<32x32xf32>, vector<8x32xf32> -> vector<8x32xf32>
    %37 = vector.broadcast %6 : vector<1x32xf32> to vector<8x32xf32>
    %38 = arith.addf %36, %37 : vector<8x32xf32>
    %39 = arith.addf %1, %38 : vector<8x32xf32>
    %cst_19 = arith.constant dense<0.000000e+00> : vector<8xf32>
    %40 = vector.multi_reduction <add>, %39, %cst_19 [1] : vector<8x32xf32> to vector<8xf32>
    %41 = vector.shape_cast %40 : vector<8xf32> to vector<8x1xf32>
    %cst_20 = arith.constant 3.200000e+01 : f32
    %42 = vector.broadcast %cst_20 : f32 to vector<8x1xf32>
    %43 = arith.divf %41, %42 : vector<8x1xf32>
    %44 = vector.broadcast %43 : vector<8x1xf32> to vector<8x32xf32>
    %45 = arith.subf %39, %44 : vector<8x32xf32>
    %46 = arith.mulf %45, %45 : vector<8x32xf32>
    %cst_21 = arith.constant dense<0.000000e+00> : vector<8xf32>
    %47 = vector.multi_reduction <add>, %46, %cst_21 [1] : vector<8x32xf32> to vector<8xf32>
    %48 = vector.shape_cast %47 : vector<8xf32> to vector<8x1xf32>
    %cst_22 = arith.constant 3.200000e+01 : f32
    %49 = vector.broadcast %cst_22 : f32 to vector<8x1xf32>
    %50 = arith.divf %48, %49 : vector<8x1xf32>
    %cst_23 = arith.constant 9.99999974E-6 : f32
    %51 = vector.broadcast %cst_23 : f32 to vector<8x1xf32>
    %52 = arith.addf %50, %51 : vector<8x1xf32>
    %53 = math.rsqrt %52 : vector<8x1xf32>
    %54 = vector.broadcast %53 : vector<8x1xf32> to vector<8x32xf32>
    %55 = arith.mulf %45, %54 : vector<8x32xf32>
    %56 = vector.broadcast %7 : vector<1x32xf32> to vector<8x32xf32>
    %57 = arith.mulf %55, %56 : vector<8x32xf32>
    %58 = vector.broadcast %8 : vector<1x32xf32> to vector<8x32xf32>
    %59 = arith.addf %57, %58 : vector<8x32xf32>
    %c0_24 = arith.constant 0 : index
    %c0_25 = arith.constant 0 : index
    %c0_26 = arith.constant 0 : index
    %60 = vector.load %arg5[%c0_24, %c0_25, %c0_26] : memref<1x8x32xf32, #tpu.memory_space<vmem>>, vector<1x8x32xf32>
    %61 = vector.shape_cast %60 : vector<1x8x32xf32> to vector<8x32xf32>
    %62 = vector.shape_cast %59 : vector<8x32xf32> to vector<1x8x32xf32>
    tpu.vector_store %arg5[%c0_24, %c0_25, %c0_26], %62 {strides = array<i32>} : memref<1x8x32xf32, #tpu.memory_space<vmem>>, vector<1x8x32xf32>,
    return
  }
  func.func @transform_0(%arg0: i32) -> (i32, i32, i32) {
    %c0_i32 = arith.constant 0 : i32
    %c0_i32_0 = arith.constant 0 : i32
    %c0_i32_1 = arith.constant 0 : i32
    return %arg0, %c0_i32, %c0_i32_0 : i32, i32, i32
  }
  func.func @transform_1(%arg0: i32) -> (i32, i32) {
    %c0_i32 = arith.constant 0 : i32
    %c0_i32_0 = arith.constant 0 : i32
    %c0_i32_1 = arith.constant 0 : i32
    return %c0_i32, %c0_i32_0 : i32, i32
  }
  func.func @transform_2(%arg0: i32) -> (i32, i32) {
    %c0_i32 = arith.constant 0 : i32
    %c0_i32_0 = arith.constant 0 : i32
    %c0_i32_1 = arith.constant 0 : i32
    return %c0_i32, %c0_i32_0 : i32, i32
  }
  func.func @transform_3(%arg0: i32) -> (i32, i32) {
    %c0_i32 = arith.constant 0 : i32
    %c0_i32_0 = arith.constant 0 : i32
    %c0_i32_1 = arith.constant 0 : i32
    return %c0_i32, %c0_i32_0 : i32, i32
  }
  func.func @transform_4(%arg0: i32) -> (i32, i32, i32) {
    %c0_i32 = arith.constant 0 : i32
    %c0_i32_0 = arith.constant 0 : i32
    %c0_i32_1 = arith.constant 0 : i32
    return %arg0, %c0_i32, %c0_i32_0 : i32, i32, i32
  }
}

</mosaic_0001>

<bundles_post_ra>
// kernel: tpu_custom_call.1
= control target key start
LH: loop header
LB: loop body
LE: loop exit
PB: predicated region body
PF: predicated region fallthrough
CT: control target
= control target key end

     0   :  { %9 = vsyncpa [#allocation3], 0  ;;  %s1721_s0 = inlined_call_operand.vmem [shape: f32[2,8,32], index: 0, kind: input, shape index: {}]   ;;  %s1722_s1 = inlined_call_operand.vmem [shape: f32[32,128], index: 1, kind: input, shape index: {}]   ;;  %s1723_s2 = inlined_call_operand.vmem [shape: f32[2,96], index: 2, kind: input, shape index: {}]   ;;  %s1724_s3 = inlined_call_operand.vmem [shape: f32[64,40], index: 3, kind: input, shape index: {}]   ;;  %s1725_s4 = inlined_call_operand.hbm [shape: f32[2,8,32], index: 4, kind: output, shape index: {}]  }
   0x1   :  { %11 = vsyncpa [#allocation3 + $0x1], 0  ;;  %s1414_s15 = smov 0   ;;  %s1416_s16 = smov 0  }
   0x2   :  { %s1418_s17 = smov 0   ;;  %s1420_s18 = smov 0  }
   0x3 LB: > { %s1435_s19 = sadd.s32 4294967295, %s1380_s18   ;;  %s1002_s20 = sadd.s32 4294967294, %s1380_s18   ;;  %s1380_s18 = sphi %s1420_s18, %s1733_s18   ;;  %s1376_s17 = sphi %s1418_s17, %s1732_s17   ;;  %s1372_s16 = sphi %s1416_s16, %s1731_s16   ;;  %s1368_s15 = sphi %s1414_s15, %s1730_s15  }
   0x4   : > { %s1439_s21 = sadd.s32 1, %s1380_s18   ;;  %s113_s22 = sadd.s32 1, %s1376_s17 }
   0x5   : > { %s110_s23 = ssub.s32 %s1380_s18, %s1439_s21  ;;  %p123_p0 = scmp.ne.s32.totalorder %s1376_s17, %s1372_s16 }
   0x6   : > { %p111_p1 = scmp.eq.s32.totalorder %s110_s23, 0  ;;  %p124_p2 = scmp.eq.s32.totalorder %s1435_s19, 1 }
   0x7   : > { %p129_p3 = scmp.ne.s32.totalorder %s1372_s16, %s1368_s15  ;;  %p130_p4 = scmp.eq.s32.totalorder %s1002_s20, 1 }
   0x8   : > { %s1450_s24 = scalar_select %p111_p1, %s1376_s17, %s113_s22  }
   0x9   : > { %p1452_p5 = por %p124_p2, %p123_p0  ;;  %p1456_p6 = por %p130_p4, %p129_p3 }
   0xa   : > { %p1005_p7 = scmp.ge.s32.totalorder %s1380_s18, 1  ;;  %p164_p8 = scmp.lt.s32.totalorder %s1380_s18, 3 }
   0xc   : > { %p165_p9 = pnand %p1005_p7, %p164_p8 }
   0xd   : > { %v1465_v0 = vld [vmem:[%s1722_s1] sm:$0xff] (!%p165_p9)  ;;  %v1470_v1 = vld [vmem:[%s1722_s1 + $0x8] sm:$0xff] (!%p165_p9)  ;;  %v1475_v2 = vld [vmem:[%s1722_s1 + $0x10] sm:$0xff] (!%p165_p9)  ;;  %v1382_v3 = vmov (!%p165_p9), 0.0|0.0   ;;  %vm1383_vm0 = vmmov (!%p165_p9), 0   ;;  %v1384_v7 = vmov (!%p165_p9), 0.0  }
   0xe   : > { %168 = sbr.rel (%p165_p9) target bundleno = 1752 (0x6d8), region = 36  ;;  %1205 = vmatprep.subr.bf16.mxu0 (!%p165_p9), %v1382_v3  ;;  %v1302_v4 = vpack.i.bf16 (!%p165_p9), %v1470_v1, %v1465_v0  ;;  %v1206_v5 = vpack.c.bf16 (!%p165_p9), %v1470_v1, %v1465_v0  ;;  %v1485_v6 = vld [vmem:[%s1722_s1 + $0x18] sm:$0xff] (!%p165_p9)  ;;  %1106 = vmatprep.mubr.msk.f32.mxu0 (!%p165_p9), %vm1383_vm0, %v1384_v7  ;;  %p189_p10 = scmp.lt.s32.totalorder (!%p165_p9), %s1435_s19, 1  ;;  %v1493_v8 = vld [vmem:[%s1724_s3 + $0x8] sm:$0xff] (!%p165_p9)  ;;  %v1503_v10 = vld [vmem:[%s1724_s3 + $0x10] sm:$0xff] (!%p165_p9)  ;;  %vm212_vm1 = vcmask (!%p165_p9), 261120  }
   0xf   : > { %s1385_s11 = smov (!%p165_p9), 96   ;;  %v1209_v9 = vpack.c.bf16 (!%p165_p9), %v1485_v6, %v1475_v2  ;;  %v1516_v12 = vld [vmem:[%s1724_s3 + $0x20] sm:$0xff] (!%p165_p9)  ;;  %v1525_v13 = vld [vmem:[%s1724_s3 + $0x30] sm:$0xff] (!%p165_p9)  ;;  %s1386_s8 = smov (!%p165_p9), 64   ;;  %v1548_v19 = vld [vmem:[%s1724_s3 + $0x18] sm:$0xff] (!%p165_p9)  ;;  %vm314_vm2 = vcmask (!%p165_p9), 64512  }
  0x10   : > { %296 = vrot.lane.b32.xlu1 (!%p165_p9), %v1493_v8, %s1385_s11  ;;  %1207 = vmatpush3.bf16.msra.mxu0 (!%p165_p9), %v1206_v5  ;;  %v1008_v14 = vld [vmem:[%s1723_s2] ss:$0 sm:$0xff] (!%p165_p9)  ;;  %v1555_v20 = vld [vmem:[%s1724_s3 + $0x28] sm:$0xff] (!%p165_p9)  ;;  %v1562_v21 = vld [vmem:[%s1724_s3 + $0x38] sm:$0xff] (!%p165_p9)  ;;  %vm656_vm4 = vcmask (!%p165_p9), 523264   ;;  %s186_s30 = sand.u32 (!%p165_p9), 1, %s1372_s16  }
  0x11   : > { %1208 = vmatprep.subr.bf16.mxu0 (!%p165_p9), %v1382_v3  ;;  %v1541_v18 = vld [vmem:[%s1724_s3] sm:$0xff] (!%p165_p9)  ;;  %vm1598_vm3 = vmpackc.low (!%p165_p9), %vm212_vm1, %vm212_vm1  ;;  %s1006_s5 = sshll.u32 (!%p165_p9), %s186_s30, 3  ;;  %s1040_s6 = sshll.u32 (!%p165_p9), %s1435_s19, 7 }
  0x12   : > { %v1037_v40 = vld [vmem:[%s1723_s2 + $0x1] ss:$0 sm:$0xff] (!%p165_p9)  ;;  %s188_s7 = scalar_lea.vmem (!%p165_p9), [#allocation2], %s1006_s5 }
  0x14   : > { %298 = vrot.lane.b32.xlu1 (!%p165_p9), %v1503_v10, %s1385_s11  ;;  %1210 = vmatpush3.bf16.msra.mxu0 (!%p165_p9), %v1209_v9 }
  0x15   : > { %s190_s12 = scalar_select %p189_p10, %s1435_s19, 1 }
  0x16   : > { %s1388_s19 = smov [#allocation2]  }
  0x17   : > { %s1007_s20 = sshll.u32 %s190_s12, 3  ;;  %s930_s12 = scalar_lea.sflag [#allocation3], %s186_s30 }
  0x18   : > { %s192_s27 = scalar_lea.vmem %s1721_s0, %s1007_s20  ;;  %302 = vrot.lane.b32.xlu1 %v1516_v12, %s1385_s11  ;;  %s1322_s14 = sshll.u32 %s1388_s19, 4  ;;  %s1323_s14 = int_to_ptr.vmem [resolvable:$false] %s1322_s14 }
  0x19   : > { %v1511_v11 = vld [vmem:[%s192_s27] sm:$0xff]  ;;  %s1387_s27 = smov 32   ;;  %s1324_s20 = scalar_lea.vmem %s1323_s14, 256 }
  0x1a   : > { %1107 = vmatmul.mubr.msk.f32.vlgmr.msra.gmra.mrb[0].mxu0 %vm212_vm1, %v1511_v11 }
  0x1c   : > { %306 = vrot.lane.b32.xlu1 %v1525_v13, %s1385_s11 }
  0x82   : > { %v297_v22 = vpop.permute.xlu1 %296 }
  0x86   : > { %v299_v23 = vpop.permute.xlu1 %298 }
  0x8a   : > { %v303_v24 = vpop.permute.xlu1 %302 }
  0x8e   : > { %v307_v25 = vpop.permute.xlu1 %306 }
  0xed   : > { %v282_v15 = vpop.f32.mrb[0].mxu0 }
  0xee   : > { %v1532_v16 = vadd.f32 %v1008_v14, %v282_v15  ;;  %v1108_v17 = vpop.f32.mrb[1].mxu0 }
  0xf0   : > { %444 = vrot.lane.b32.xlu1 %v1532_v16, %s1386_s8  ;;  %311 = vrot.lane.b32.xlu0 %v1532_v16, %s1385_s11 }
  0xf4   : > { %294 = vrot.lane.b32.xlu0 %v1541_v18, %s1385_s11  ;;  %1303 = vrot.lane.b32.xlu1 %v1302_v4, %s1387_s27 }
  0xf8   : > { %300 = vrot.lane.b32.xlu0 %v1548_v19, %s1385_s11 }
  0xfc   : > { %304 = vrot.lane.b32.xlu0 %v1555_v20, %s1385_s11 }
 0x100   : > { %308 = vrot.lane.b32.xlu0 %v1562_v21, %s1385_s11 }
 0x162   : > { %v445_v26 = vpop.permute.xlu1 %444  ;;  %v312_v27 = vpop.permute.xlu0 %311 }
 0x163   : > { %1109 = vmatprep.subr.mxu1 %v312_v27  ;;  %1123 = vmatprep.subr.mxu0 %v445_v26 }
 0x164   : > { %1110 = vmatpush3.msra.mxu1 %v312_v27  ;;  %1124 = vmatpush3.msra.mxu0 %v445_v26  ;;  %v1228_v26 = vpack.c.bf16 %v1493_v8, %v1541_v18 }
 0x165   : > { %1211 = vmatprep.subr.bf16.mxu1 %v1382_v3  ;;  %1227 = vmatprep.subr.bf16.mxu0 %v1382_v3 }
 0x166   : > { %v295_v28 = vpop.permute.xlu0 %294  ;;  %v1304_v0 = vpop.permute.xlu1 %1303 }
 0x167   : > { %1111 = vmatprep.mubr.msk.f32.mxu1 %vm314_vm2, %v295_v28  ;;  %1125 = vmatprep.mubr.msk.f32.mxu0 %vm314_vm2, %v295_v28  ;;  %v1306_v1 = vunpack.i.h.bf16 %v1304_v0 }
 0x168   : > { %1112 = vmatmul.mubr.msk.f32.vlgmr.msra.gmra.mrb[0].mxu1 %vm314_vm2, %v297_v22  ;;  %1126 = vmatmul.mubr.msk.f32.vlgmr.msra.gmra.mrb[2].mxu0 %vm314_vm2, %v297_v22 }
 0x169   : > { %1114 = vmatprep.mubr.msk.f32.mxu1 %vm314_vm2, %v299_v23  ;;  %1128 = vmatprep.mubr.msk.f32.mxu0 %vm314_vm2, %v299_v23 }
 0x16a   : > { %v301_v29 = vpop.permute.xlu0 %300  ;;  %1229 = vmatpush3.bf16.msra.mxu0 %v1228_v26 }
 0x16b   : > { %1230 = vmatprep.subr.bf16.mxu0 %v1382_v3 }
 0x16c   : > { %1115 = vmatmul.mubr.msk.f32.gmra.mrb[2].mxu1 %vm314_vm2, %v301_v29  ;;  %1129 = vmatmul.mubr.msk.f32.gmra.mrb[4].mxu0 %vm314_vm2, %v301_v29 }
 0x16d   : > { %1117 = vmatprep.mubr.msk.f32.mxu1 %vm314_vm2, %v303_v24  ;;  %1131 = vmatprep.mubr.msk.f32.mxu0 %vm314_vm2, %v303_v24 }
 0x16e   : > { %v305_v30 = vpop.permute.xlu0 %304 }
 0x170   : > { %1118 = vmatmul.mubr.msk.f32.gmra.mrb[4].mxu1 %vm314_vm2, %v305_v30  ;;  %1132 = vmatmul.mubr.msk.f32.gmra.mrb[6].mxu0 %vm314_vm2, %v305_v30  ;;  %v1231_v30 = vpack.c.bf16 %v1548_v19, %v1503_v10 }
 0x171   : > { %1120 = vmatprep.mubr.msk.f32.mxu1 %vm314_vm2, %v307_v25  ;;  %1134 = vmatprep.mubr.msk.f32.mxu0 %vm314_vm2, %v307_v25 }
 0x172   : > { %v309_v31 = vpop.permute.xlu0 %308  ;;  %1232 = vmatpush3.bf16.msra.mxu0 %v1231_v30 }
 0x173   : > { %1233 = vmatprep.subr.bf16.mxu0 %v1382_v3 }
 0x174   : > { %1121 = vmatmul.mubr.msk.f32.gmra.mrb[6].mxu1 %vm314_vm2, %v309_v31  ;;  %1135 = vmatmul.mubr.msk.f32.gmra.mrb[8].mxu0 %vm314_vm2, %v309_v31 }
 0x175   : > { %1153 = vmatprep.mubr.msk.f32.mxu1 %vm1383_vm0, %v1384_v7  ;;  %1172 = vmatprep.mubr.msk.f32.mxu0 %vm1383_vm0, %v1384_v7 }
 0x23b   : > { %v1113_v32 = vpop.f32.mrb[0].mxu1  ;;  %v1127_v33 = vpop.f32.mrb[2].mxu0 }
 0x23c   : > { %v437_v34 = vmul.f32 %v1113_v32, %v1493_v8  ;;  %v1590_v35 = vmul.f32 %v1127_v33, %v1493_v8  ;;  %v397_v36 = vpop.f32.mrb[1].mxu1  ;;  %v513_v37 = vpop.f32.mrb[3].mxu0  ;;  %v1237_v8 = vpack.c.bf16 %v1562_v21, %v1525_v13 }
 0x23d   : > { %v436_v38 = vmul.f32 %v397_v36, %v1541_v18  ;;  %v1594_v39 = vmul.f32 %v513_v37, %v1541_v18 }
 0x23f   : > { %v1212_v41 = vpack.c.bf16 %v437_v34, %v436_v38  ;;  %v1240_v42 = vpack.c.bf16 %v1590_v35, %v1594_v39  ;;  %v1116_v43 = vpop.f32.mrb[2].mxu1  ;;  %v1130_v44 = vpop.f32.mrb[4].mxu0 }
 0x240   : > { %v439_v45 = vmul.f32 %v1116_v43, %v1548_v19  ;;  %v1606_v46 = vmul.f32 %v1130_v44, %v1548_v19  ;;  %v407_v47 = vpop.f32.mrb[3].mxu1  ;;  %v523_v48 = vpop.f32.mrb[5].mxu0 }
 0x241   : > { %1214 = vmatpush3.bf16.xpose.msk.msra.mxu1 %vm1598_vm3, %v1212_v41  ;;  %v438_v49 = vmul.f32 %v407_v47, %v1503_v10  ;;  %v554_v50 = vmul.f32 %v523_v48, %v1503_v10  ;;  %v1307_v10 = vpack.i.bf16 %v1485_v6, %v1475_v2  ;;  %v1305_v2 = vunpack.i.l.bf16 %v1304_v0 }
 0x242   : > { %1215 = vmatprep.subr.bf16.mxu1 %v1382_v3 }
 0x243   : > { %v1216_v51 = vpack.c.bf16 %v439_v45, %v438_v49  ;;  %v1243_v52 = vpack.c.bf16 %v1606_v46, %v554_v50  ;;  %v1119_v53 = vpop.f32.mrb[4].mxu1  ;;  %v1133_v54 = vpop.f32.mrb[6].mxu0  ;;  %1308 = vrot.lane.b32.xlu1 %v1307_v10, %s1387_s27  ;;  %v1252_v4 = vpack.c.bf16 %v1306_v1, %v1305_v2 }
 0x244   : > { %v441_v55 = vmul.f32 %v1119_v53, %v1555_v20  ;;  %v557_v56 = vmul.f32 %v1133_v54, %v1555_v20  ;;  %v417_v57 = vpop.f32.mrb[5].mxu1  ;;  %v533_v58 = vpop.f32.mrb[7].mxu0 }
 0x245   : > { %v440_v59 = vmul.f32 %v417_v57, %v1516_v12  ;;  %v556_v60 = vmul.f32 %v533_v58, %v1516_v12 }
 0x247   : > { %v1220_v61 = vpack.c.bf16 %v441_v55, %v440_v59  ;;  %v1246_v62 = vpack.c.bf16 %v557_v56, %v556_v60  ;;  %v1122_v63 = vpop.f32.mrb[6].mxu1  ;;  %v1136_v5 = vpop.f32.mrb[8].mxu0 }
 0x248   : > { %v443_v9 = vmul.f32 %v1122_v63, %v1562_v21  ;;  %v559_v14 = vmul.f32 %v1136_v5, %v1562_v21  ;;  %v427_v15 = vpop.f32.mrb[7].mxu1  ;;  %v543_v17 = vpop.f32.mrb[9].mxu0 }
 0x249   : > { %1218 = vmatpush3.bf16.xpose.msk.msra.mxu1 %vm1598_vm3, %v1216_v51  ;;  %v442_v22 = vmul.f32 %v427_v15, %v1525_v13  ;;  %v558_v23 = vmul.f32 %v543_v17, %v1525_v13 }
 0x24a   : > { %1219 = vmatprep.subr.bf16.mxu1 %v1382_v3 }
 0x24b   : > { %v1224_v24 = vpack.c.bf16 %v443_v9, %v442_v22  ;;  %v1249_v25 = vpack.c.bf16 %v559_v14, %v558_v23 }
 0x251   : > { %1222 = vmatpush3.bf16.xpose.msk.msra.mxu1 %vm1598_vm3, %v1220_v61 }
 0x252   : > { %1223 = vmatprep.subr.bf16.mxu1 %v1382_v3 }
 0x259   : > { %1226 = vmatpush3.bf16.xpose.msk.msra.mxu1 %vm1598_vm3, %v1224_v24 }
 0x25a   : > { %1251 = vmatprep.subr.bf16.mxu1 %v1382_v3 }
 0x260   : > { %1154 = vmatmul.mubr.msk.f32.vlgmr.msra.gmra.mrb[8].mxu1 %vm212_vm1, %v1532_v16  ;;  %v1234_v16 = vpack.c.bf16 %v1555_v20, %v1516_v12 }
 0x261   : > { %1202 = vmatprep.mubr.msk.f32.mxu1 %vm1383_vm0, %v1384_v7  ;;  %1253 = vmatpush3.bf16.msra.mxu1 %v1252_v4 }
 0x262   : > { %1235 = vmatpush3.bf16.msra.mxu0 %v1234_v16  ;;  %1254 = vmatprep.subr.bf16.mxu1 %v1382_v3 }
 0x263   : > { %1236 = vmatprep.subr.bf16.mxu0 %v1382_v3 }
 0x266   : > { %1238 = vmatpush3.bf16.msra.mxu0 %v1237_v8 }
 0x267   : > { %1239 = vmatprep.subr.bf16.mxu0 %v1382_v3 }
 0x2b5   : > { %v1309_v6 = vpop.permute.xlu1 %1308 }
 0x2b6   : > { %v1311_v13 = vunpack.i.h.bf16 %v1309_v6  ;;  %v1310_v21 = vunpack.i.l.bf16 %v1309_v6 }
 0x333   : > { %v652_v27 = vpop.f32.mrb[8].mxu1 }
 0x334   : > { %v1155_v28 = vpop.f32.mrb[9].mxu1  ;;  %v657_v29 = vsel %vm656_vm4, %v652_v27, -inf }
 0x335   : > { %658 = vmax.xlane.f32.xlu0 %v657_v29 }
 0x3c2   : > { %v659_v18 = vpop.xlane.xlu0 %658 }
 0x3c3   : > { %v660_v12 = vsub.f32 %v652_v27, %v659_v18 }
 0x3c5   : > { %v661_v19 = vmul.f32 1.442695, %v660_v12 }
 0x3c7   : > { %1312 = vpow2.f32 %v661_v19 }
 0x3d1   : > { %v1313_v20 = vpop.eup %1312 }
 0x3d2   : > { %1173 = vmatmul.mubr.msk.f32.vlgmr.msra.gmra.mrb[10].mxu0 %vm656_vm4, %v1313_v20 }
 0x3d3   : > { %1241 = vmatpush3.bf16.msra.mxu0 %v1240_v42  ;;  %1191 = vmatprep.mubr.msk.f32.mxu0 %vm1383_vm0, %v1384_v7  ;;  %v1255_v7 = vpack.c.bf16 %v1311_v13, %v1310_v21 }
 0x3d4   : > { %1242 = vmatprep.subr.bf16.mxu0 %v1382_v3 }
 0x3d5   : > { %1256 = vmatpush3.bf16.msra.mxu1 %v1255_v7 }
 0x3d7   : > { %1244 = vmatpush3.bf16.msra.mxu0 %v1243_v52 }
 0x3d8   : > { %1245 = vmatprep.subr.bf16.mxu0 %v1382_v3 }
 0x3db   : > { %1247 = vmatpush3.bf16.msra.mxu0 %v1246_v62 }
 0x3dc   : > { %1248 = vmatprep.subr.bf16.mxu0 %v1382_v3 }
 0x3df   : > { %1250 = vmatpush3.bf16.msra.mxu0 %v1249_v25 }
 0x3e2   : > { %1192 = vmatmul.mubr.msk.f32.vlgmr.msra.gmra.mrb[12].mxu0 %vm656_vm4, %v1313_v20 }
 0x4a5   : > { %v732_v31 = vpop.f32.mrb[10].mxu0 }
 0x4a6   : > { %1314 = vrcp.f32 %v732_v31  ;;  %v1174_v32 = vpop.f32.mrb[11].mxu0 }
 0x4b0   : > { %v1315_v33 = vpop.eup %1314 }
 0x4b1   : > { %v807_v34 = vmul.f32 %v1315_v33, %v732_v31 }
 0x4b3   : > { %v808_v35 = vsub.f32 2.0, %v807_v34 }
 0x4b5   : > { %v802_v36 = vpop.f32.mrb[12].mxu0  ;;  %v809_v37 = vmul.f32 %v1315_v33, %v808_v35 }
 0x4b6   : > { %v1193_v38 = vpop.f32.mrb[13].mxu0 }
 0x4b7   : > { %v810_v39 = vmul.f32 %v809_v37, %v802_v36 }
 0x4b9   : > { %1203 = vmatmul.mubr.msk.f32.vlgmr.msra.gmra.mrb[10].mxu1 %vm212_vm1, %v810_v39 }
 0x58c   : > { %v900_v41 = vpop.f32.mrb[10].mxu1 }
 0x58d   : > { %v901_v3 = vadd.f32 %v1037_v40, %v900_v41  ;;  %v1204_v42 = vpop.f32.mrb[11].mxu1 }
 0x58f   : > { %v904_v43 = vadd.f32 %v901_v3, %v1511_v11 }
 0x591   : > { %v905_v44 = vsel %vm212_vm1, %v904_v43, 0.0 }
 0x592   : > { %906 = vadd.xlane.f32.xlu1 %v905_v44 }
 0x5a3   : > { %924 = vrot.lane.b32.xlu1 %v1037_v40, %s1386_s8  ;;  %s943_s8 = sshll.u32 %s188_s7, 4  ;;  %s1680_s8 = int_to_ptr.vmem [resolvable:$true] %s943_s8 }
 0x5a4   : > { %s1318_s13 = scalar_lea.vmem %s1680_s8, 128  ;;  %p1325_p0 = scmp.lt.s32.totalorder %s1680_s8, %s1323_s14 }
 0x5a5   : > { %p1319_p11 = scmp.ne.s32.totalorder %s1680_s8, %s1318_s13  ;;  %p1326_p1 = scmp.lt.s32.totalorder %s1324_s20, %s1318_s13 }
 0x5a7   : > { %p1320_p12 = pnand %p1319_p11, %p1452_p5  ;;  %p1327_p2 = por %p1326_p1, %p1325_p0 }
 0x5a9   : > { %p1321_p13 = pneg %p1320_p12 }
 0x5ab   : > { %p1328_p3 = pnand %p1327_p2, %p1321_p13 }
 0x61f   : > { %v907_v45 = vpop.xlane.xlu1 %906 }
 0x620   : > { %v909_v46 = vmul.f32 0.03125, %v907_v45 }
 0x622   : > { %v910_v47 = vsub.f32 %v904_v43, %v909_v46 }
 0x623   : > { %v925_v55 = vpop.permute.xlu1 %924 }
 0x624   : > { %v911_v48 = vmul.f32 %v910_v47, %v910_v47 }
 0x626   : > { %v912_v49 = vsel %vm212_vm1, %v911_v48, 0.0 }
 0x627   : > { %913 = vadd.xlane.f32.xlu0 %v912_v49 }
 0x63d   : > { %920 = vrot.lane.b32.xlu0 %v1037_v40, %s1385_s11  ;;  %s1678_s11 = scalar_lea.hbm %s1725_s4, %s1040_s6 }
 0x6b4   : > { %v914_v50 = vpop.xlane.xlu0 %913 }
 0x6b5   : > { %v915_v51 = vmul.f32 0.03125, %v914_v50 }
 0x6b7   : > { %v916_v52 = vadd.f32 1e-05, %v915_v51 }
 0x6b8   : > { %v921_v53 = vpop.permute.xlu0 %920 }
 0x6b9   : > { %1316 = vrsqrt.f32 %v916_v52 }
 0x6c3   : > { %v1317_v11 = vpop.eup %1316 }
 0x6c4   : > { %v918_v54 = vmul.f32 %v1317_v11, %v910_v47 }
 0x6c6   : > { %v923_v56 = vmul.f32 %v921_v53, %v918_v54 }
 0x6c8   : > { %v927_v57 = vadd.f32 %v925_v55, %v923_v56 }
 0x6ca   : > { %928 = vst.msk [vmem:[%s188_s7] sm:$0xff] %vm212_vm1, %v927_v57 }
 0x6cb   : > { %1331 = shalt.err (!%p1328_p3)
}
 0x6cc   : > { %s1332_s22 = scalar_lea.hbm %s1678_s11, 128  ;;  %s1336_s28 = scalar_lea.hbm %s1725_s4, 256 }
 0x6cd   : > { %p1333_p4 = scmp.ne.s32.totalorder %s1678_s11, %s1332_s22  ;;  %p1337_p9 = scmp.lt.u32.totalorder %s1678_s11, %s1725_s4 }
 0x6ce   : > { %p1338_p10 = scmp.lt.u32.totalorder %s1336_s28, %s1332_s22  ;;  %p1340_p12 = scmp.lt.u32.totalorder %s1332_s22, %s1678_s11 }
 0x6cf   : > { %p1334_p7 = pnand %p1333_p4, %p1452_p5 }
 0x6d0   : > { %p1339_p11 = por %p1338_p10, %p1337_p9 }
 0x6d1   : > { %p1335_p8 = pneg %p1334_p7 }
 0x6d2   : > { %p1341_p13 = por %p1340_p12, %p1339_p11 }
 0x6d4   : > { %p1342_p0 = pnand %p1341_p13, %p1335_p8 }
 0x6d6   : > { %1345 = shalt.err (!%p1342_p0)
}
 0x6d7   : > { %1257 = dma.vmem_to_hbm [thread:$0]  (%p1452_p5), %s1680_s8, 128, %s1678_s11, %s930_s12  }
 0x6d8 PF: > { %p1263_p1 = scmp.ge.s32.totalorder %s1380_s18, 2  ;;  %s955_s5 = sand.u32 1, %s1368_s15  }
 0x6d9   : > { %s956_s6 = scalar_lea.sflag [#allocation3], %s955_s5 }
 0x6da   : > { %p1260_p2 = pnand %p1263_p1, %p1456_p6 }
 0x6dc   : > { %1363 = dma.done.wait (!%p1260_p2), %s956_s6, 128  }
 0x6dd   : > { %1365 = vsyncadd (!%p1260_p2), %s956_s6, 4294967168  ;;  %p14_p3 = scmp.ge.s32.totalorder %s1439_s21, 4   ;;  %s1730_s15 = smov %s1372_s16 }
 0x6de   : > { %s1731_s16 = smov %s1376_s17  ;;  %s1732_s17 = smov %s1450_s24 }
 0x6df   : > { %s1733_s18 = smov %s1439_s21  ;;  %16 = sbr.rel (!%p14_p3) target bundleno = 3 (0x3), region = 71 }
 0x6e6   :  { %961 = vsyncpa [#allocation3], 1 }
 0x6e7   :  { %963 = vsyncpa [#allocation3 + $0x1], 1 }

</bundles_post_ra>
